<compile_context>
chip_gen: v7x
topology: tpu7x:2x2x1
jax: 0.10.0
libtpu: 0.0.40
codegen_flags: <defaults>
</compile_context>

<pallas_src>
import jax
import jax.numpy as jnp
from jax.experimental import pallas as pl
from jax.experimental.pallas import tpu as pltpu

LANE = 128
SUBLANE = 8


def _cdiv(a, b):
    return -(-a // b)


def _device_kind():
    try:
        return jax.devices()[0].device_kind.lower()
    except Exception:
        return ""


def _make_wmse_kernel(rows, tile_rows, acc_rows, bps, needs_mask):
    """Weighted-SSE kernel: sum of w*(p-l)^2 with w=5 iff l==0."""
    first_masked = rows // tile_rows   # blocks strictly below this are fully valid

    def kernel(pred_ref, label_ref, out_ref, acc_ref):
        i = pl.program_id(1)                  # block index inside this shard
        nblk = pl.num_programs(1)             # blocks per shard

        @pl.when(i == 0)
        def _init():
            acc_ref[...] = jnp.zeros_like(acc_ref)

        # Native-dtype DMA; up-cast on the VPU (hidden under DMA).
        p = pred_ref[...].astype(jnp.float32)
        l = label_ref[...].astype(jnp.float32)
        w = jnp.where(l == 0.0, 5.0, 1.0)
        d = p - l
        wse = w * d * d                       # (tile_rows, LANE) f32

        def fold(vals):
            # Shallow fold into acc_rows//8 independent accumulator vregs.
            if tile_rows == acc_rows:
                acc_ref[...] += vals
            else:
                acc_ref[...] += vals.reshape(
                    tile_rows // acc_rows, acc_rows, LANE).sum(axis=0)

        if needs_mask:
            c = pl.program_id(0)
            logical_blk = c * bps + i         # unclamped logical block index

            @pl.when(logical_blk < first_masked)
            def _interior():                  # fully-valid block: no mask work
                fold(wse)

            @pl.when(logical_blk >= first_masked)
            def _tail():                      # partial / duplicate block
                row_ids = jax.lax.broadcasted_iota(
                    jnp.int32, (tile_rows, LANE), 0)
                rows_left = rows - logical_blk * tile_rows  # may be <= 0
                fold(jnp.where(row_ids < rows_left, wse, 0.0))
        else:
            fold(wse)

        @pl.when(i == nblk - 1)
        def _finalize():
            # Single cross-lane/sublane reduce + (1,1) store, once per shard.
            out_ref[...] = jnp.zeros_like(out_ref) + jnp.sum(acc_ref[...])

    return kernel


def custom_mse_loss(prediction, label, *, tile_rows=None, num_shards=None,
                    min_pallas_elems=1 << 15):
    """Pallas equivalent of CustomMSELoss.forward(prediction, label)."""
    assert prediction.shape == label.shape
    n = prediction.size

    kind = _device_kind()
    is_v7 = "v7" in kind
    if tile_rows is None:
        tile_rows = 8192 if is_v7 else 4096   # 4 MiB / 2 MiB f32 input blocks
    if num_shards is None:
        num_shards = 2 if is_v7 else 1        # 2 TCs only on v7x

    p_item = jnp.dtype(prediction.dtype).itemsize
    l_item = jnp.dtype(label.dtype).itemsize
    # dtype-dependent sublane packing: f32 -> 8, bf16/f16 -> 16, int8/fp8 -> 32
    sub_mult = SUBLANE * max(1, 4 // min(p_item, 4))
    sub_mult = max(sub_mult, SUBLANE * max(1, 4 // min(l_item, 4)))

    rows = n // LANE                          # full 128-lane rows

    if n < min_pallas_elems or rows < sub_mult:
        # Tiny-input fast path: XLA fuses this for free; kernel launch would dominate.
        w = jnp.where(label == 0, jnp.float32(5.0), jnp.float32(1.0))
        d = prediction.astype(jnp.float32) - label.astype(jnp.float32)
        return jnp.sum(w * d * d) / jnp.float32(n)

    pf = prediction.reshape(-1)               # free bitcast
    lf = label.reshape(-1)
    n_main = rows * LANE

    if n_main != n:
        # Only the 128-aligned prefix goes through Pallas; the <128-element
        # tail is folded in plain JAX below.  No padded copy is ever built.
        pm = pf[:n_main].reshape(rows, LANE)
        lm = lf[:n_main].reshape(rows, LANE)
    else:
        pm = pf.reshape(rows, LANE)
        lm = lf.reshape(rows, LANE)

    # Tile rows: multiple of 64 (covers 8/16/32 sublane packing and the 64-row
    # accumulator) when possible, never larger than the slab.
    unit = 64 if rows >= 64 else sub_mult
    tr = max(unit, (min(tile_rows, rows) // unit) * unit)
    acc_rows = min(64, tr)

    num_blocks = _cdiv(rows, tr)
    shards = max(1, min(num_shards, num_blocks))
    bps = _cdiv(num_blocks, shards)           # blocks per shard

    needs_mask = (shards * bps * tr) != rows
    clamp = shards * bps > num_blocks         # only then can logical blk overflow
    last_blk = num_blocks - 1

    def in_map(c, i):
        blk = c * bps + i
        if clamp:
            # Keep the DMA start in bounds; the in-kernel row mask zeroes any
            # logically out-of-range contribution.
            blk = jnp.minimum(blk, last_blk)
        return (blk, 0)

    kernel = _make_wmse_kernel(rows, tr, acc_rows, bps, needs_mask)

    cost = pl.CostEstimate(
        flops=6 * n_main,
        transcendentals=0,
        bytes_accessed=n_main * (p_item + l_item) + 4 * shards,
    )

    partials = pl.pallas_call(
        kernel,
        out_shape=jax.ShapeDtypeStruct((shards, 1), jnp.float32),
        grid=(shards, bps),
        in_specs=[
            pl.BlockSpec((tr, LANE), in_map),
            pl.BlockSpec((tr, LANE), in_map),
        ],
        out_specs=pl.BlockSpec((1, 1), lambda c, i: (c, 0)),
        scratch_shapes=[pltpu.VMEM((acc_rows, LANE), jnp.float32)],
        compiler_params=pltpu.CompilerParams(
            dimension_semantics=("parallel", "arbitrary"),
            vmem_limit_bytes=64 << 20,
        ),
        cost_estimate=cost,
    )(pm, lm)

    total = jnp.sum(partials)

    if n_main != n:
        # <128-element tail, folded in plain JAX (fused by XLA).
        tp = pf[n_main:].astype(jnp.float32)
        tl = lf[n_main:].astype(jnp.float32)
        tw = jnp.where(tl == 0.0, 5.0, 1.0)
        total = total + jnp.sum(tw * (tp - tl) * (tp - tl))

    return total / jnp.float32(n)


def _reference(prediction, label):
    mask = jnp.where(label == 0.0, 5.0, 1.0)
    d = prediction.astype(jnp.float32) - label.astype(jnp.float32)
    return jnp.mean(mask * d * d)


def _make_inputs(key, shape):
    k1, k2, k3, key = jax.random.split(key, 4)
    prediction = jax.random.normal(k1, shape, dtype=jnp.float32)
    raw_label = jax.random.normal(k2, shape, dtype=jnp.float32)
    zero_mask = jax.random.uniform(k3, shape) < 0.3
    label = jnp.where(zero_mask, 0.0, raw_label)
    return prediction, label, key


if __name__ == "__main__":
    key = jax.random.PRNGKey(0)

    # 1) spec shape: NCHW [2, 4, 16, 16] — force the Pallas path (single block)
    prediction, label, key = _make_inputs(key, (2, 4, 16, 16))
    loss = jax.block_until_ready(
        custom_mse_loss(prediction, label, min_pallas_elems=0))
    ref = _reference(prediction, label)
    assert jnp.allclose(loss, ref, rtol=1e-4, atol=1e-6), (loss, ref)

    # 2) larger input: multi-block streaming path (and 2-shard split on v7x)
    prediction, label, key = _make_inputs(key, (16, 8, 128, 128))
    loss = jax.block_until_ready(custom_mse_loss(prediction, label))
    ref = _reference(prediction, label)
    assert jnp.allclose(loss, ref, rtol=1e-4, atol=1e-6), (loss, ref)

    # 3) odd size: partial last block (row mask) + <128-element JAX tail,
    #    with no padded/concatenated copy of the inputs.
    prediction, label, key = _make_inputs(key, (3, 5, 7, 11))
    loss = jax.block_until_ready(
        custom_mse_loss(prediction, label, min_pallas_elems=0))
    ref = _reference(prediction, label)
    assert jnp.allclose(loss, ref, rtol=1e-4, atol=1e-6), (loss, ref)

    print("KERNEL_OK")
</pallas_src>

<mosaic_0001>
module attributes {stable_mosaic.version = 11 : i64} {
  func.func @kernel(%arg0: i32, %arg1: i32, %arg2: memref<16x128xf32, #tpu.memory_space<vmem>>, %arg3: memref<16x128xf32, #tpu.memory_space<vmem>>, %arg4: memref<1x1xf32, #tpu.memory_space<vmem>>, %arg5: memref<16x128xf32, #tpu.memory_space<vmem>>) attributes {dimension_semantics = [#tpu.dimension_semantics<parallel>, #tpu.dimension_semantics<arbitrary>], iteration_bounds = array<i64: 1, 1>, scalar_prefetch = 0 : i64, scratch_operands = 1 : i64, tpu.core_type = #tpu.core_type<tc>, window_params = [{transform_indices = @transform_0, window_bounds = array<i64: 16, 128>}, {transform_indices = @transform_1, window_bounds = array<i64: 16, 128>}, {transform_indices = @transform_2, window_bounds = array<i64: 1, 1>}]} {
    %c0_i32 = arith.constant 0 : i32
    %0 = arith.cmpi eq, %arg1, %c0_i32 : i32
    %1 = arith.extui %0 : i1 to i32
    %c0_i32_0 = arith.constant 0 : i32
    %2 = arith.cmpi ne, %1, %c0_i32_0 : i32
    scf.if %2 {
      %cst_12 = arith.constant 0.000000e+00 : f32
      %19 = vector.broadcast %cst_12 : f32 to vector<16x128xf32>
      %c0_13 = arith.constant 0 : index
      %c0_14 = arith.constant 0 : index
      %20 = vector.load %arg5[%c0_13, %c0_14] : memref<16x128xf32, #tpu.memory_space<vmem>>, vector<16x128xf32>
      tpu.vector_store %arg5[%c0_13, %c0_14], %19 {strides = array<i32>} : memref<16x128xf32, #tpu.memory_space<vmem>>, vector<16x128xf32>,
    } else {
    }
    %c0 = arith.constant 0 : index
    %c0_1 = arith.constant 0 : index
    %3 = vector.load %arg2[%c0, %c0_1] : memref<16x128xf32, #tpu.memory_space<vmem>>, vector<16x128xf32>
    %c0_2 = arith.constant 0 : index
    %c0_3 = arith.constant 0 : index
    %4 = vector.load %arg3[%c0_2, %c0_3] : memref<16x128xf32, #tpu.memory_space<vmem>>, vector<16x128xf32>
    %cst = arith.constant 0.000000e+00 : f32
    %5 = vector.broadcast %cst : f32 to vector<16x128xf32>
    %6 = arith.cmpf oeq, %4, %5 : vector<16x128xf32>
    %cst_4 = arith.constant 5.000000e+00 : f32
    %cst_5 = arith.constant 1.000000e+00 : f32
    %7 = vector.broadcast %cst_4 : f32 to vector<16x128xf32>
    %8 = vector.broadcast %cst_5 : f32 to vector<16x128xf32>
    %9 = arith.select %6, %7, %8 : vector<16x128xi1>, vector<16x128xf32>
    %10 = arith.subf %3, %4 : vector<16x128xf32>
    %11 = arith.mulf %9, %10 : vector<16x128xf32>
    %12 = arith.mulf %11, %10 : vector<16x128xf32>
    %c0_6 = arith.constant 0 : index
    %c0_7 = arith.constant 0 : index
    %13 = vector.load %arg5[%c0_6, %c0_7] : memref<16x128xf32, #tpu.memory_space<vmem>>, vector<16x128xf32>
    %14 = arith.addf %13, %12 : vector<16x128xf32>
    %c0_8 = arith.constant 0 : index
    %c0_9 = arith.constant 0 : index
    %15 = vector.load %arg5[%c0_8, %c0_9] : memref<16x128xf32, #tpu.memory_space<vmem>>, vector<16x128xf32>
    tpu.vector_store %arg5[%c0_8, %c0_9], %14 {strides = array<i32>} : memref<16x128xf32, #tpu.memory_space<vmem>>, vector<16x128xf32>,
    %c0_i32_10 = arith.constant 0 : i32
    %16 = arith.cmpi eq, %arg1, %c0_i32_10 : i32
    %17 = arith.extui %16 : i1 to i32
    %c0_i32_11 = arith.constant 0 : i32
    %18 = arith.cmpi ne, %17, %c0_i32_11 : i32
    scf.if %18 {
      %cst_12 = arith.constant 0.000000e+00 : f32
      %19 = vector.broadcast %cst_12 : f32 to vector<1x1xf32>
      %c0_13 = arith.constant 0 : index
      %c0_14 = arith.constant 0 : index
      %20 = vector.load %arg5[%c0_13, %c0_14] : memref<16x128xf32, #tpu.memory_space<vmem>>, vector<16x128xf32>
      %21 = vector.shape_cast %20 : vector<16x128xf32> to vector<1x16x128xf32>
      %cst_15 = arith.constant dense<0.000000e+00> : vector<1xf32>
      %22 = vector.multi_reduction <add>, %21, %cst_15 [1, 2] : vector<1x16x128xf32> to vector<1xf32>
      %23 = vector.shape_cast %22 : vector<1xf32> to vector<1x1x1xf32>
      %24 = vector.extract %23[0, 0, 0] : f32 from vector<1x1x1xf32>
      %25 = vector.broadcast %24 : f32 to vector<1x1xf32>
      %26 = arith.addf %19, %25 : vector<1x1xf32>
      %c0_16 = arith.constant 0 : index
      %c0_17 = arith.constant 0 : index
      %27 = vector.load %arg4[%c0_16, %c0_17] : memref<1x1xf32, #tpu.memory_space<vmem>>, vector<1x1xf32>
      tpu.vector_store %arg4[%c0_16, %c0_17], %26 {strides = array<i32>} : memref<1x1xf32, #tpu.memory_space<vmem>>, vector<1x1xf32>,
    } else {
    }
    return
  }
  func.func @transform_0(%arg0: i32, %arg1: i32) -> (i32, i32) {
    %c1_i32 = arith.constant 1 : i32
    %0 = arith.muli %arg0, %c1_i32 : i32
    %1 = arith.addi %0, %arg1 : i32
    %c0_i32 = arith.constant 0 : i32
    %c0_i32_0 = arith.constant 0 : i32
    return %1, %c0_i32 : i32, i32
  }
  func.func @transform_1(%arg0: i32, %arg1: i32) -> (i32, i32) {
    %c1_i32 = arith.constant 1 : i32
    %0 = arith.muli %arg0, %c1_i32 : i32
    %1 = arith.addi %0, %arg1 : i32
    %c0_i32 = arith.constant 0 : i32
    %c0_i32_0 = arith.constant 0 : i32
    return %1, %c0_i32 : i32, i32
  }
  func.func @transform_2(%arg0: i32, %arg1: i32) -> (i32, i32) {
    %c0_i32 = arith.constant 0 : i32
    %c0_i32_0 = arith.constant 0 : i32
    return %arg0, %c0_i32 : i32, i32
  }
}

</mosaic_0001>

<bundles_post_ra>
// kernel: tpu_custom_call.1
= control target key start
LH: loop header
LB: loop body
LE: loop exit
PB: predicated region body
PF: predicated region fallthrough
CT: control target
= control target key end

     0   :  { %7 = vsyncpa [#allocation4], 0  ;;  %s250_s0 = inlined_call_operand.hbm [shape: f32[16,128], index: 0, kind: input, shape index: {}]   ;;  %s251_s1 = inlined_call_operand.hbm [shape: f32[16,128], index: 1, kind: input, shape index: {}]   ;;  %s252_s2 = inlined_call_operand.hbm [shape: f32[1,1], index: 2, kind: output, shape index: {}]  }
   0x1   :  { %8 = vsyncpa [#allocation7], 0 }
   0x2   :  { %9 = vsyncpa [#allocation5], 0  ;;  %s193_s9 = smov [#allocation3]   ;;  %s121_s13 = scalar_lea.hbm %s250_s0, 256 }
   0x3   :  { %s19_s10 = sshll.u32 %s193_s9, 4  ;;  %p122_p0 = scmp.ne.s32.totalorder %s250_s0, %s121_s13  ;;  %s20_s10 = int_to_ptr.vmem [resolvable:$true] %s19_s10 }
   0x4   :  { %p125_p1 = scmp.lt.u32.totalorder %s121_s13, %s250_s0 }
   0x6   :  { %p127_p2 = pnand %p125_p1, %p122_p0 }
   0x8   :  { %130 = shalt.err (!%p127_p2)
}
   0x9   :  { %s131_s18 = scalar_lea.vmem %s20_s10, 256  ;;  %p136_p4 = scmp.lt.s32.totalorder %s20_s10, %s20_s10 }
   0xa   :  { %p132_p3 = scmp.ne.s32.totalorder %s20_s10, %s131_s18  ;;  %p137_p5 = scmp.lt.s32.totalorder %s131_s18, %s131_s18 }
   0xc   :  { %p138_p6 = por %p137_p5, %p136_p4 }
   0xe   :  { %p139_p7 = pnand %p138_p6, %p132_p3 }
  0x10   :  { %142 = shalt.err (!%p139_p7)
}
  0x11   :  { %s194_s19 = smov 128   ;;  %s195_s20 = smov 8  }
  0x12   :  { %25 = dma.hbm_to_vmem [thread:$0]  %s250_s0, 256, %s20_s10, [#allocation4], %s194_s19, %s194_s19, %s195_s20  }
  0x13   :  { %s196_s23 = smov [#allocation6]   ;;  %s143_s27 = scalar_lea.hbm %s251_s1, 256 }
  0x14   :  { %s35_s24 = sshll.u32 %s196_s23, 4  ;;  %p144_p8 = scmp.ne.s32.totalorder %s251_s1, %s143_s27  ;;  %s36_s24 = int_to_ptr.vmem [resolvable:$true] %s35_s24 }
  0x15   :  { %p147_p9 = scmp.lt.u32.totalorder %s143_s27, %s251_s1 }
  0x17   :  { %p149_p10 = pnand %p147_p9, %p144_p8 }
  0x19   :  { %152 = shalt.err (!%p149_p10)
}
  0x1a   :  { %s153_s4 = scalar_lea.vmem %s36_s24, 256  ;;  %p158_p12 = scmp.lt.s32.totalorder %s36_s24, %s36_s24 }
  0x1b   :  { %p154_p11 = scmp.ne.s32.totalorder %s36_s24, %s153_s4  ;;  %p159_p13 = scmp.lt.s32.totalorder %s153_s4, %s153_s4 }
  0x1d   :  { %p160_p0 = por %p159_p13, %p158_p12 }
  0x1f   :  { %p161_p1 = pnand %p160_p0, %p154_p11 }
  0x21   :  { %164 = shalt.err (!%p161_p1)
}
  0x22   :  { %41 = dma.hbm_to_vmem [thread:$0]  %s251_s1, 256, %s36_s24, [#allocation7], %s194_s19, %s194_s19, %s195_s20  }
  0x23   :  { %187 = dma.done.wait [#allocation4], 256  }
  0x24   :  { %188 = vsyncadd [#allocation4], 4294967040 }
  0x25   :  { %189 = dma.done.wait [#allocation7], 256  }
  0x26   :  { %190 = vsyncadd [#allocation7], 4294967040  ;;  %v58_v0 = vld [vmem:[#allocation3] sm:$0xff]  ;;  %v59_v1 = vld [vmem:[#allocation3 + $0x8] sm:$0xff]  ;;  %v197_v5 = vmov 1.0   ;;  %s198_s1 = smov [#allocation8]  }
  0x27   :  { %v60_v2 = vld [vmem:[#allocation6] sm:$0xff]  ;;  %v61_v3 = vld [vmem:[#allocation6 + $0x8] sm:$0xff]  ;;  %s103_s6 = sshll.u32 %s198_s1, 4  ;;  %vm95_vm2 = vcmask 0   ;;  %s104_s6 = int_to_ptr.vmem [resolvable:$true] %s103_s6 }
  0x28   :  { %vm62_vm0 = vcmp.eq.f32.partialorder %v60_v2, 0.0  ;;  %v66_v4 = vsub.f32 %v58_v0, %v60_v2  ;;  %vm63_vm1 = vcmp.eq.f32.partialorder %v61_v3, 0.0  ;;  %v67_v7 = vsub.f32 %v59_v1, %v61_v3  ;;  %s165_s8 = scalar_lea.vmem %s104_s6, 16  ;;  %s169_s9 = scalar_lea.vmem %s104_s6, 32 }
  0x29   :  { %v64_v6 = vsel %vm62_vm0, 5.0, %v197_v5  ;;  %v65_v8 = vsel %vm63_vm1, 5.0, %v197_v5  ;;  %p166_p2 = scmp.ne.s32.totalorder %s104_s6, %s165_s8  ;;  %p170_p3 = scmp.lt.s32.totalorder %s104_s6, %s104_s6 }
  0x2a   :  { %v68_v9 = vmul.f32 %v66_v4, %v64_v6  ;;  %v69_v10 = vmul.f32 %v67_v7, %v65_v8  ;;  %p171_p4 = scmp.lt.s32.totalorder %s169_s9, %s165_s8 }
  0x2c   :  { %v70_v11 = vmul.f32 %v68_v9, %v66_v4  ;;  %v71_v12 = vmul.f32 %v69_v10, %v67_v7  ;;  %p172_p5 = por %p171_p4, %p170_p3 }
  0x2e   :  { %v83_v13 = vadd.f32 %v71_v12, %v70_v11  ;;  %p173_p6 = pnand %p172_p5, %p166_p2 }
  0x30   :  { %84 = vadd.xlane.f32.xlu0 %v83_v13 }
  0xbd   :  { %v85_v14 = vpop.xlane.xlu0 %84 }
  0xbe   :  { %v86_v15 = vrot.slane %v85_v14, 4 }
  0xc0   :  { %v87_v16 = vadd.f32 %v86_v15, %v85_v14 }
  0xc2   :  { %v88_v17 = vrot.slane %v87_v16, 2 }
  0xc4   :  { %v89_v18 = vadd.f32 %v88_v17, %v87_v16 }
  0xc6   :  { %v90_v19 = vrot.slane %v89_v18, 1 }
  0xc8   :  { %v91_v20 = vadd.f32 %v90_v19, %v89_v18 }
  0xca   :  { %113 = vpush %v91_v20 }
  0xfb   :  { %s114_s7 = spop %113 }
  0xfc   :  { %v93_v21 = vstv %s114_s7 }
  0xfd   :  { %96 = vst.msk [vmem:[#allocation8] sm:$0x1] %vm95_vm2, %v93_v21 }
  0xfe   :  { %176 = shalt.err (!%p173_p6)
}
  0xff   :  { %s177_s12 = scalar_lea.hbm %s252_s2, 16 }
 0x100   :  { %p178_p7 = scmp.ne.s32.totalorder %s252_s2, %s177_s12  ;;  %p181_p8 = scmp.lt.u32.totalorder %s177_s12, %s252_s2 }
 0x102   :  { %p183_p9 = pnand %p181_p8, %p178_p7 }
 0x104   :  { %186 = shalt.err (!%p183_p9)
}
 0x105   :  { %106 = dma.vmem_to_hbm [thread:$0]  %s104_s6, 16, %s252_s2, [#allocation5]  }
 0x106   :  { %191 = dma.done.wait [#allocation5], 16  }
 0x107   :  { %192 = vsyncadd [#allocation5], 4294967280 }
 0x108   :  { %110 = vsyncpa [#allocation4], 1 }
 0x109   :  { %111 = vsyncpa [#allocation7], 1 }
 0x10a   :  { %112 = vsyncpa [#allocation5], 1 }

</bundles_post_ra>
